<compile_context>
chip_gen: v6e
topology: v6e:2x2x1
jax: 0.10.0
libtpu: 0.0.40
codegen_flags: <defaults>
</compile_context>

<pallas_src>
import functools

import numpy as np

import jax
import jax.numpy as jnp
from jax.experimental import pallas as pl
from jax.experimental.pallas import tpu as pltpu


def _round_up(x, m):
    return (x + m - 1) // m * m


# ----------------------------------------------------------------------------
# Fused Pallas kernel: [conv1_1||conv1_2 -> relu] (1 matmul)  ->  folded
# [conv2 -> flatten -> linear] (elementwise + 2 tiny matmuls)
# ----------------------------------------------------------------------------
def _convnet_kernel(x_ref, w1_ref, b1_ref, a_ref, masks_ref, tile_ref, sel_ref,
                    fb_ref, out_ref, xpad_ref, pbuf_ref,
                    *, H, W, NB, C, CP, PAD):
    """Fully fused forward for one batch chunk (one grid step).

    x_ref     : (NB, C, H*W)        input chunk, NCHW flattened over (H, W)
    w1_ref    : (C1, 9*CP)          conv1_1||conv1_2 weights, tap-major, chan-padded
    b1_ref    : (C1, 1)
    a_ref     : (F, C1, H*W)        folded conv2+linear matrix
    masks_ref : (9, 1, NB*H*W)      per-tap border-validity masks (0/1)
    tile_ref  : (H*W, NB*H*W)       constant: tiles a (., H*W) slab across samples
    sel_ref   : (NB*H*W, NB)        constant: per-sample lane-block summation
    fb_ref    : SMEM (F,)           fused bias (lin_b + conv2_b * lin_w.sum())
    out_ref   : (1, 1, F*NB)        lane-dense output row for this chunk
    xpad_ref  : VMEM (CP, NB*H*W + 2*PAD)  zero-padded lane-packed input
    pbuf_ref  : VMEM (9*CP, NB*H*W)        im2col patch matrix
    """
    f32 = jnp.float32
    HW = H * W
    L = NB * HW

    # ---- Stage 0: lane-pack the batch into a zero-padded scratch ------------
    xpad_ref[...] = jnp.zeros_like(xpad_ref)
    for n in range(NB):
        xpad_ref[pl.ds(0, C), pl.ds(PAD + n * HW, HW)] = x_ref[n]

    # ---- Stage 1: im2col via 9 static lane shifts, then ONE MXU matmul ------
    # Column l = n*HW + h*W + w ; row j = (kh*3+kw)*CP + c.
    t = 0
    for kh in range(3):
        for kw in range(3):
            k = (kh - 1) * W + (kw - 1)                      # lane shift
            sh = xpad_ref[:, pl.ds(PAD + k, L)]              # (CP, L)
            if not (kh == 1 and kw == 1):
                sh = sh * masks_ref[t]                       # zero invalid taps
            pbuf_ref[pl.ds(t * CP, CP), :] = sh
            t += 1

    y1 = jnp.dot(w1_ref[...], pbuf_ref[...],
                 preferred_element_type=f32)                 # (C1, L), 1 push
    y1 = jnp.maximum(y1 + b1_ref[...], 0.0)                  # bias + ReLU

    # ---- Stage 2: folded conv2 + flatten + linear ----------------------------
    # out[f, n] = sum_{c,s} A[f,c,s] * y1[c, n*HW+s] + fb[f]
    F = a_ref.shape[0]
    rows = []
    for f in range(F):
        a_t = jnp.dot(a_ref[f], tile_ref[...],
                      preferred_element_type=f32)            # (C1, L): A tiled over NB
        col = jnp.sum(a_t * y1, axis=0, keepdims=True)       # (1, L)
        row = jnp.dot(col, sel_ref[...],
                      preferred_element_type=f32)            # (1, NB)
        rows.append(row + fb_ref[f])
    out_row = rows[0] if F == 1 else jnp.concatenate(rows, axis=-1)
    out_ref[0] = out_row.astype(out_ref.dtype)               # one lane-dense store


# ----------------------------------------------------------------------------
# Wrapper: one pallas_call for the whole batch.
#   batch_chunks=1  -> single grid step (best on single-TC v5e / v6e)
#   batch_chunks=2  -> 2-way "parallel" grid (use on v7x to feed both TCs)
# ----------------------------------------------------------------------------
def convnet_forward(x_nchw, kp, *, batch_chunks=1):
    N, C, H, W = x_nchw.shape
    HW = H * W
    assert N % batch_chunks == 0
    NB = N // batch_chunks
    L = NB * HW
    PAD = W + 1
    CP = _round_up(C, 8)

    C1 = kp["w1"].shape[0]
    F = kp["A"].shape[0]
    assert kp["w1"].shape[1] == 9 * CP
    assert kp["A"].shape == (F, C1, HW)

    # Free (contiguous) reshape only — no host transpose, no HBM round trip.
    x_flat = x_nchw.reshape(N, C, HW)

    # Tiny constant tables (built at trace time, shipped like weights).
    masks = np.zeros((9, 1, L), np.float32)
    t = 0
    for kh in range(3):
        for kw in range(3):
            dh, dw = kh - 1, kw - 1
            m = np.zeros((H, W), np.float32)
            m[max(0, -dh):H - max(0, dh), max(0, -dw):W - max(0, dw)] = 1.0
            masks[t, 0] = np.tile(m.reshape(HW), NB)
            t += 1
    tile = np.tile(np.eye(HW, dtype=np.float32), (1, NB))         # (HW, L)
    sel = np.zeros((L, NB), np.float32)
    for n in range(NB):
        sel[n * HW:(n + 1) * HW, n] = 1.0

    kernel = functools.partial(_convnet_kernel, H=H, W=W, NB=NB, C=C, CP=CP,
                               PAD=PAD)
    out = pl.pallas_call(
        kernel,
        out_shape=jax.ShapeDtypeStruct((batch_chunks, 1, F * NB), jnp.float32),
        grid=(batch_chunks,),
        in_specs=[
            pl.BlockSpec((NB, C, HW), lambda i: (i, 0, 0)),        # x chunk
            pl.BlockSpec((C1, 9 * CP), lambda i: (0, 0)),          # w1 (resident)
            pl.BlockSpec((C1, 1), lambda i: (0, 0)),               # b1
            pl.BlockSpec((F, C1, HW), lambda i: (0, 0, 0)),        # folded A
            pl.BlockSpec((9, 1, L), lambda i: (0, 0, 0)),          # tap masks
            pl.BlockSpec((HW, L), lambda i: (0, 0)),               # batch-tile matrix
            pl.BlockSpec((L, NB), lambda i: (0, 0)),               # per-sample sum
            pl.BlockSpec(memory_space=pltpu.MemorySpace.SMEM),     # fused bias
        ],
        out_specs=pl.BlockSpec((1, 1, F * NB), lambda i: (i, 0, 0)),
        scratch_shapes=[
            pltpu.VMEM((CP, L + 2 * PAD), jnp.float32),            # packed padded x
            pltpu.VMEM((9 * CP, L), jnp.float32),                  # im2col patches
        ],
        compiler_params=pltpu.CompilerParams(
            dimension_semantics=("parallel",)),
    )(x_flat, kp["w1"], kp["b1"], kp["A"], jnp.asarray(masks),
      jnp.asarray(tile), jnp.asarray(sel), kp["fb"])

    # (chunks, 1, F*NB) with f-major lanes  ->  (N, F)
    out = out.reshape(batch_chunks, F, NB)
    return jnp.transpose(out, (0, 2, 1)).reshape(N, F)


# ----------------------------------------------------------------------------
# One-time offline weight re-layout + conv2/linear algebraic fold
# ----------------------------------------------------------------------------
def prepare_params(params, H, W):
    HW = H * W
    w_cat = np.concatenate([np.asarray(params["conv1_1_w"]),
                            np.asarray(params["conv1_2_w"])], axis=0)  # (C1,C,3,3)
    b_cat = np.concatenate([np.asarray(params["conv1_1_b"]),
                            np.asarray(params["conv1_2_b"])])          # (C1,)
    C1, C = w_cat.shape[0], w_cat.shape[1]
    CP = _round_up(C, 8)

    # conv1 weights in matmul layout: (C1, 9*CP), column (kh*3+kw)*CP + c,
    # channel slots padded to 8 so the kernel's patch stores stay tile-aligned.
    w1 = np.zeros((C1, 9 * CP), np.float32)
    for kh in range(3):
        for kw in range(3):
            t = kh * 3 + kw
            w1[:, t * CP:t * CP + C] = w_cat[:, :, kh, kw]
    b1 = b_cat.reshape(C1, 1).astype(np.float32)

    # Fold conv2 + linear (both linear, no nonlinearity between them):
    #   out = lin_w @ T2 @ vec(relu_concat) + (lin_b + conv2_b * lin_w.sum())
    w2 = np.asarray(params["conv2_w"])      # (1, C1, 3, 3)
    b2 = np.asarray(params["conv2_b"])      # (1,)
    lw = np.asarray(params["lin_w"]).astype(np.float32)   # (F, HW)
    lb = np.asarray(params["lin_b"]).astype(np.float32)   # (F,)
    F = lw.shape[0]
    T2 = np.zeros((HW, C1 * HW), np.float32)
    for h in range(H):
        for w in range(W):
            for dh in (-1, 0, 1):
                for dw in (-1, 0, 1):
                    hh, ww = h + dh, w + dw
                    if 0 <= hh < H and 0 <= ww < W:
                        for c in range(C1):
                            T2[h * W + w, c * HW + hh * W + ww] = \
                                w2[0, c, dh + 1, dw + 1]
    A = (lw @ T2).reshape(F, C1, HW)
    fb = (lb + b2[0] * lw.sum(axis=1)).astype(np.float32)

    return {
        "w1": jnp.asarray(w1),
        "b1": jnp.asarray(b1),
        "A": jnp.asarray(A),
        "fb": jnp.asarray(fb),
    }


# ----------------------------------------------------------------------------
# Deterministic parameter init (PyTorch-style uniform(-1/sqrt(fan_in), +...))
# ----------------------------------------------------------------------------
def init_params(key, in_channels, hidden, out_features):
    ks = jax.random.split(key, 8)

    def u(k, shape, fan_in):
        bound = 1.0 / jnp.sqrt(jnp.float32(fan_in))
        return jax.random.uniform(k, shape, jnp.float32, -bound, bound)

    return {
        "conv1_1_w": u(ks[0], (10, in_channels, 3, 3), in_channels * 9),
        "conv1_1_b": u(ks[1], (10,), in_channels * 9),
        "conv1_2_w": u(ks[2], (10, in_channels, 3, 3), in_channels * 9),
        "conv1_2_b": u(ks[3], (10,), in_channels * 9),
        "conv2_w":   u(ks[4], (1, 20, 3, 3), 20 * 9),
        "conv2_b":   u(ks[5], (1,), 20 * 9),
        "lin_w":     u(ks[6], (out_features, hidden), hidden),
        "lin_b":     u(ks[7], (out_features,), hidden),
    }


# ----------------------------------------------------------------------------
# Pure-JAX reference (for correctness check)
# ----------------------------------------------------------------------------
def ref_forward(x, params):
    def conv(z, w, b):
        y = jax.lax.conv_general_dilated(
            z, w, (1, 1), padding=((1, 1), (1, 1)),
            dimension_numbers=("NCHW", "OIHW", "NCHW"))
        return y + b[None, :, None, None]

    x1 = jax.nn.relu(conv(x, params["conv1_1_w"], params["conv1_1_b"]))
    x2 = jax.nn.relu(conv(x, params["conv1_2_w"], params["conv1_2_b"]))
    xc = jnp.concatenate([x1, x2], axis=1)
    y = conv(xc, params["conv2_w"], params["conv2_b"])
    y = y.reshape(y.shape[0], -1)
    return y @ params["lin_w"].T + params["lin_b"]


if __name__ == "__main__":
    # hidden = 20 in the PyTorch script => flattened conv2 output (1*H*W) == 20.
    N, C, H, W = 2, 4, 4, 5          # H * W == 20 == hidden
    out_features = 1

    key = jax.random.PRNGKey(0)
    kx, kparam = jax.random.split(key)
    x = jax.random.normal(kx, (N, C, H, W), jnp.float32)
    params = init_params(kparam, C, H * W, out_features)
    kparams = prepare_params(params, H, W)   # one-time re-layout + conv2/linear fold

    # batch_chunks=1: single grid step (v5e/v6e).  On v7x, batch_chunks=2 feeds
    # both TensorCores via the "parallel" grid axis.
    fwd = jax.jit(functools.partial(convnet_forward, batch_chunks=1))
    out = jax.block_until_ready(fwd(x, kparams))
    assert out.shape == (N, out_features)

    ref = ref_forward(x, params)
    assert jnp.allclose(out, ref, atol=1e-4, rtol=1e-4), (out, ref)

    print("KERNEL_OK")
</pallas_src>

<mosaic_0001>
module attributes {stable_mosaic.version = 11 : i64} {
  func.func @_convnet_kernel(%arg0: i32, %arg1: memref<2x4x20xf32, #tpu.memory_space<vmem>>, %arg2: memref<20x72xf32, #tpu.memory_space<vmem>>, %arg3: memref<20x1xf32, #tpu.memory_space<vmem>>, %arg4: memref<1x20x20xf32, #tpu.memory_space<vmem>>, %arg5: memref<9x1x40xf32, #tpu.memory_space<vmem>>, %arg6: memref<20x40xf32, #tpu.memory_space<vmem>>, %arg7: memref<40x2xf32, #tpu.memory_space<vmem>>, %arg8: memref<1xf32, #tpu.memory_space<smem>>, %arg9: memref<1x1x2xf32, #tpu.memory_space<vmem>>, %arg10: memref<8x52xf32, #tpu.memory_space<vmem>>, %arg11: memref<72x40xf32, #tpu.memory_space<vmem>>) attributes {dimension_semantics = [#tpu.dimension_semantics<parallel>], iteration_bounds = array<i64: 1>, scalar_prefetch = 0 : i64, scratch_operands = 2 : i64, tpu.core_type = #tpu.core_type<tc>, window_params = [{transform_indices = @transform_0, window_bounds = array<i64: 2, 4, 20>}, {pipeline_mode = #tpu.pipeline_mode<synchronous>, transform_indices = @transform_1, window_bounds = array<i64: 20, 72>}, {pipeline_mode = #tpu.pipeline_mode<synchronous>, transform_indices = @transform_2, window_bounds = array<i64: 20, 1>}, {pipeline_mode = #tpu.pipeline_mode<synchronous>, transform_indices = @transform_3, window_bounds = array<i64: 1, 20, 20>}, {pipeline_mode = #tpu.pipeline_mode<synchronous>, transform_indices = @transform_4, window_bounds = array<i64: 9, 1, 40>}, {pipeline_mode = #tpu.pipeline_mode<synchronous>, transform_indices = @transform_5, window_bounds = array<i64: 20, 40>}, {pipeline_mode = #tpu.pipeline_mode<synchronous>, transform_indices = @transform_6, window_bounds = array<i64: 40, 2>}, {transform_indices = @transform_7, window_bounds = array<i64: 1>}, {transform_indices = @transform_8, window_bounds = array<i64: 1, 1, 2>}]} {
    %cst = arith.constant 0.000000e+00 : f32
    %0 = vector.broadcast %cst : f32 to vector<8x52xf32>
    %c0 = arith.constant 0 : index
    %c0_0 = arith.constant 0 : index
    %1 = vector.load %arg10[%c0, %c0_0] : memref<8x52xf32, #tpu.memory_space<vmem>>, vector<8x52xf32>
    tpu.vector_store %arg10[%c0, %c0_0], %0 {strides = array<i32>} : memref<8x52xf32, #tpu.memory_space<vmem>>, vector<8x52xf32>,
    %c0_1 = arith.constant 0 : index
    %c0_2 = arith.constant 0 : index
    %c0_3 = arith.constant 0 : index
    %2 = vector.load %arg1[%c0_1, %c0_2, %c0_3] : memref<2x4x20xf32, #tpu.memory_space<vmem>>, vector<1x4x20xf32>
    %3 = vector.shape_cast %2 : vector<1x4x20xf32> to vector<4x20xf32>
    %c0_4 = arith.constant 0 : index
    %c6 = arith.constant 6 : index
    %4 = vector.load %arg10[%c0_4, %c6] : memref<8x52xf32, #tpu.memory_space<vmem>>, vector<4x20xf32>
    tpu.vector_store %arg10[%c0_4, %c6], %3 {strides = array<i32>} : memref<8x52xf32, #tpu.memory_space<vmem>>, vector<4x20xf32>,
    %c1 = arith.constant 1 : index
    %c0_5 = arith.constant 0 : index
    %c0_6 = arith.constant 0 : index
    %5 = vector.load %arg1[%c1, %c0_5, %c0_6] : memref<2x4x20xf32, #tpu.memory_space<vmem>>, vector<1x4x20xf32>
    %6 = vector.shape_cast %5 : vector<1x4x20xf32> to vector<4x20xf32>
    %c0_7 = arith.constant 0 : index
    %c26 = arith.constant 26 : index
    %7 = vector.load %arg10[%c0_7, %c26] : memref<8x52xf32, #tpu.memory_space<vmem>>, vector<4x20xf32>
    tpu.vector_store %arg10[%c0_7, %c26], %6 {strides = array<i32>} : memref<8x52xf32, #tpu.memory_space<vmem>>, vector<4x20xf32>,
    %c0_8 = arith.constant 0 : index
    %c0_9 = arith.constant 0 : index
    %8 = vector.load %arg10[%c0_8, %c0_9] : memref<8x52xf32, #tpu.memory_space<vmem>>, vector<8x40xf32>
    %c0_10 = arith.constant 0 : index
    %c0_11 = arith.constant 0 : index
    %c0_12 = arith.constant 0 : index
    %9 = vector.load %arg5[%c0_10, %c0_11, %c0_12] : memref<9x1x40xf32, #tpu.memory_space<vmem>>, vector<1x1x40xf32>
    %10 = vector.shape_cast %9 : vector<1x1x40xf32> to vector<1x40xf32>
    %11 = vector.broadcast %10 : vector<1x40xf32> to vector<8x40xf32>
    %12 = arith.mulf %8, %11 : vector<8x40xf32>
    %c0_13 = arith.constant 0 : index
    %c0_14 = arith.constant 0 : index
    %13 = vector.load %arg11[%c0_13, %c0_14] : memref<72x40xf32, #tpu.memory_space<vmem>>, vector<8x40xf32>
    tpu.vector_store %arg11[%c0_13, %c0_14], %12 {strides = array<i32>} : memref<72x40xf32, #tpu.memory_space<vmem>>, vector<8x40xf32>,
    %c0_15 = arith.constant 0 : index
    %c1_16 = arith.constant 1 : index
    %14 = vector.load %arg10[%c0_15, %c1_16] : memref<8x52xf32, #tpu.memory_space<vmem>>, vector<8x40xf32>
    %c1_17 = arith.constant 1 : index
    %c0_18 = arith.constant 0 : index
    %c0_19 = arith.constant 0 : index
    %15 = vector.load %arg5[%c1_17, %c0_18, %c0_19] : memref<9x1x40xf32, #tpu.memory_space<vmem>>, vector<1x1x40xf32>
    %16 = vector.shape_cast %15 : vector<1x1x40xf32> to vector<1x40xf32>
    %17 = vector.broadcast %16 : vector<1x40xf32> to vector<8x40xf32>
    %18 = arith.mulf %14, %17 : vector<8x40xf32>
    %c8 = arith.constant 8 : index
    %c0_20 = arith.constant 0 : index
    %19 = vector.load %arg11[%c8, %c0_20] : memref<72x40xf32, #tpu.memory_space<vmem>>, vector<8x40xf32>
    tpu.vector_store %arg11[%c8, %c0_20], %18 {strides = array<i32>} : memref<72x40xf32, #tpu.memory_space<vmem>>, vector<8x40xf32>,
    %c0_21 = arith.constant 0 : index
    %c2 = arith.constant 2 : index
    %20 = vector.load %arg10[%c0_21, %c2] : memref<8x52xf32, #tpu.memory_space<vmem>>, vector<8x40xf32>
    %c2_22 = arith.constant 2 : index
    %c0_23 = arith.constant 0 : index
    %c0_24 = arith.constant 0 : index
    %21 = vector.load %arg5[%c2_22, %c0_23, %c0_24] : memref<9x1x40xf32, #tpu.memory_space<vmem>>, vector<1x1x40xf32>
    %22 = vector.shape_cast %21 : vector<1x1x40xf32> to vector<1x40xf32>
    %23 = vector.broadcast %22 : vector<1x40xf32> to vector<8x40xf32>
    %24 = arith.mulf %20, %23 : vector<8x40xf32>
    %c16 = arith.constant 16 : index
    %c0_25 = arith.constant 0 : index
    %25 = vector.load %arg11[%c16, %c0_25] : memref<72x40xf32, #tpu.memory_space<vmem>>, vector<8x40xf32>
    tpu.vector_store %arg11[%c16, %c0_25], %24 {strides = array<i32>} : memref<72x40xf32, #tpu.memory_space<vmem>>, vector<8x40xf32>,
    %c0_26 = arith.constant 0 : index
    %c5 = arith.constant 5 : index
    %26 = vector.load %arg10[%c0_26, %c5] : memref<8x52xf32, #tpu.memory_space<vmem>>, vector<8x40xf32>
    %c3 = arith.constant 3 : index
    %c0_27 = arith.constant 0 : index
    %c0_28 = arith.constant 0 : index
    %27 = vector.load %arg5[%c3, %c0_27, %c0_28] : memref<9x1x40xf32, #tpu.memory_space<vmem>>, vector<1x1x40xf32>
    %28 = vector.shape_cast %27 : vector<1x1x40xf32> to vector<1x40xf32>
    %29 = vector.broadcast %28 : vector<1x40xf32> to vector<8x40xf32>
    %30 = arith.mulf %26, %29 : vector<8x40xf32>
    %c24 = arith.constant 24 : index
    %c0_29 = arith.constant 0 : index
    %31 = vector.load %arg11[%c24, %c0_29] : memref<72x40xf32, #tpu.memory_space<vmem>>, vector<8x40xf32>
    tpu.vector_store %arg11[%c24, %c0_29], %30 {strides = array<i32>} : memref<72x40xf32, #tpu.memory_space<vmem>>, vector<8x40xf32>,
    %c0_30 = arith.constant 0 : index
    %c6_31 = arith.constant 6 : index
    %32 = vector.load %arg10[%c0_30, %c6_31] : memref<8x52xf32, #tpu.memory_space<vmem>>, vector<8x40xf32>
    %c32 = arith.constant 32 : index
    %c0_32 = arith.constant 0 : index
    %33 = vector.load %arg11[%c32, %c0_32] : memref<72x40xf32, #tpu.memory_space<vmem>>, vector<8x40xf32>
    tpu.vector_store %arg11[%c32, %c0_32], %32 {strides = array<i32>} : memref<72x40xf32, #tpu.memory_space<vmem>>, vector<8x40xf32>,
    %c0_33 = arith.constant 0 : index
    %c7 = arith.constant 7 : index
    %34 = vector.load %arg10[%c0_33, %c7] : memref<8x52xf32, #tpu.memory_space<vmem>>, vector<8x40xf32>
    %c5_34 = arith.constant 5 : index
    %c0_35 = arith.constant 0 : index
    %c0_36 = arith.constant 0 : index
    %35 = vector.load %arg5[%c5_34, %c0_35, %c0_36] : memref<9x1x40xf32, #tpu.memory_space<vmem>>, vector<1x1x40xf32>
    %36 = vector.shape_cast %35 : vector<1x1x40xf32> to vector<1x40xf32>
    %37 = vector.broadcast %36 : vector<1x40xf32> to vector<8x40xf32>
    %38 = arith.mulf %34, %37 : vector<8x40xf32>
    %c40 = arith.constant 40 : index
    %c0_37 = arith.constant 0 : index
    %39 = vector.load %arg11[%c40, %c0_37] : memref<72x40xf32, #tpu.memory_space<vmem>>, vector<8x40xf32>
    tpu.vector_store %arg11[%c40, %c0_37], %38 {strides = array<i32>} : memref<72x40xf32, #tpu.memory_space<vmem>>, vector<8x40xf32>,
    %c0_38 = arith.constant 0 : index
    %c10 = arith.constant 10 : index
    %40 = vector.load %arg10[%c0_38, %c10] : memref<8x52xf32, #tpu.memory_space<vmem>>, vector<8x40xf32>
    %c6_39 = arith.constant 6 : index
    %c0_40 = arith.constant 0 : index
    %c0_41 = arith.constant 0 : index
    %41 = vector.load %arg5[%c6_39, %c0_40, %c0_41] : memref<9x1x40xf32, #tpu.memory_space<vmem>>, vector<1x1x40xf32>
    %42 = vector.shape_cast %41 : vector<1x1x40xf32> to vector<1x40xf32>
    %43 = vector.broadcast %42 : vector<1x40xf32> to vector<8x40xf32>
    %44 = arith.mulf %40, %43 : vector<8x40xf32>
    %c48 = arith.constant 48 : index
    %c0_42 = arith.constant 0 : index
    %45 = vector.load %arg11[%c48, %c0_42] : memref<72x40xf32, #tpu.memory_space<vmem>>, vector<8x40xf32>
    tpu.vector_store %arg11[%c48, %c0_42], %44 {strides = array<i32>} : memref<72x40xf32, #tpu.memory_space<vmem>>, vector<8x40xf32>,
    %c0_43 = arith.constant 0 : index
    %c11 = arith.constant 11 : index
    %46 = vector.load %arg10[%c0_43, %c11] : memref<8x52xf32, #tpu.memory_space<vmem>>, vector<8x40xf32>
    %c7_44 = arith.constant 7 : index
    %c0_45 = arith.constant 0 : index
    %c0_46 = arith.constant 0 : index
    %47 = vector.load %arg5[%c7_44, %c0_45, %c0_46] : memref<9x1x40xf32, #tpu.memory_space<vmem>>, vector<1x1x40xf32>
    %48 = vector.shape_cast %47 : vector<1x1x40xf32> to vector<1x40xf32>
    %49 = vector.broadcast %48 : vector<1x40xf32> to vector<8x40xf32>
    %50 = arith.mulf %46, %49 : vector<8x40xf32>
    %c56 = arith.constant 56 : index
    %c0_47 = arith.constant 0 : index
    %51 = vector.load %arg11[%c56, %c0_47] : memref<72x40xf32, #tpu.memory_space<vmem>>, vector<8x40xf32>
    tpu.vector_store %arg11[%c56, %c0_47], %50 {strides = array<i32>} : memref<72x40xf32, #tpu.memory_space<vmem>>, vector<8x40xf32>,
    %c0_48 = arith.constant 0 : index
    %c12 = arith.constant 12 : index
    %52 = vector.load %arg10[%c0_48, %c12] : memref<8x52xf32, #tpu.memory_space<vmem>>, vector<8x40xf32>
    %c8_49 = arith.constant 8 : index
    %c0_50 = arith.constant 0 : index
    %c0_51 = arith.constant 0 : index
    %53 = vector.load %arg5[%c8_49, %c0_50, %c0_51] : memref<9x1x40xf32, #tpu.memory_space<vmem>>, vector<1x1x40xf32>
    %54 = vector.shape_cast %53 : vector<1x1x40xf32> to vector<1x40xf32>
    %55 = vector.broadcast %54 : vector<1x40xf32> to vector<8x40xf32>
    %56 = arith.mulf %52, %55 : vector<8x40xf32>
    %c64 = arith.constant 64 : index
    %c0_52 = arith.constant 0 : index
    %57 = vector.load %arg11[%c64, %c0_52] : memref<72x40xf32, #tpu.memory_space<vmem>>, vector<8x40xf32>
    tpu.vector_store %arg11[%c64, %c0_52], %56 {strides = array<i32>} : memref<72x40xf32, #tpu.memory_space<vmem>>, vector<8x40xf32>,
    %c0_53 = arith.constant 0 : index
    %c0_54 = arith.constant 0 : index
    %58 = vector.load %arg2[%c0_53, %c0_54] : memref<20x72xf32, #tpu.memory_space<vmem>>, vector<20x72xf32>
    %c0_55 = arith.constant 0 : index
    %c0_56 = arith.constant 0 : index
    %59 = vector.load %arg11[%c0_55, %c0_56] : memref<72x40xf32, #tpu.memory_space<vmem>>, vector<72x40xf32>
    %cst_57 = arith.constant dense<0.000000e+00> : vector<20x40xf32>
    %60 = tpu.matmul %58, %59, %cst_57 {dimension_numbers = #tpu.dot_dimension_numbers<[1], [0], [0], [1], [0, 0, 1, 1], [], []>} : vector<20x72xf32>, vector<72x40xf32>, vector<20x40xf32> -> vector<20x40xf32>
    %c0_58 = arith.constant 0 : index
    %c0_59 = arith.constant 0 : index
    %61 = vector.load %arg3[%c0_58, %c0_59] : memref<20x1xf32, #tpu.memory_space<vmem>>, vector<20x1xf32>
    %62 = vector.broadcast %61 : vector<20x1xf32> to vector<20x40xf32>
    %63 = arith.addf %60, %62 : vector<20x40xf32>
    %cst_60 = arith.constant 0.000000e+00 : f32
    %64 = vector.broadcast %cst_60 : f32 to vector<20x40xf32>
    %65 = arith.maximumf %63, %64 : vector<20x40xf32>
    %c0_61 = arith.constant 0 : index
    %c0_62 = arith.constant 0 : index
    %c0_63 = arith.constant 0 : index
    %66 = vector.load %arg4[%c0_61, %c0_62, %c0_63] : memref<1x20x20xf32, #tpu.memory_space<vmem>>, vector<1x20x20xf32>
    %67 = vector.shape_cast %66 : vector<1x20x20xf32> to vector<20x20xf32>
    %c0_64 = arith.constant 0 : index
    %c0_65 = arith.constant 0 : index
    %68 = vector.load %arg6[%c0_64, %c0_65] : memref<20x40xf32, #tpu.memory_space<vmem>>, vector<20x40xf32>
    %cst_66 = arith.constant dense<0.000000e+00> : vector<20x40xf32>
    %69 = tpu.matmul %67, %68, %cst_66 {dimension_numbers = #tpu.dot_dimension_numbers<[1], [0], [0], [1], [0, 0, 1, 1], [], []>} : vector<20x20xf32>, vector<20x40xf32>, vector<20x40xf32> -> vector<20x40xf32>
    %70 = arith.mulf %69, %65 : vector<20x40xf32>
    %cst_67 = arith.constant dense<0.000000e+00> : vector<40xf32>
    %71 = vector.multi_reduction <add>, %70, %cst_67 [0] : vector<20x40xf32> to vector<40xf32>
    %72 = vector.shape_cast %71 : vector<40xf32> to vector<1x40xf32>
    %c0_68 = arith.constant 0 : index
    %c0_69 = arith.constant 0 : index
    %73 = vector.load %arg7[%c0_68, %c0_69] : memref<40x2xf32, #tpu.memory_space<vmem>>, vector<40x2xf32>
    %cst_70 = arith.constant dense<0.000000e+00> : vector<1x2xf32>
    %74 = tpu.matmul %72, %73, %cst_70 {dimension_numbers = #tpu.dot_dimension_numbers<[1], [0], [0], [1], [0, 0, 1, 1], [], []>} : vector<1x40xf32>, vector<40x2xf32>, vector<1x2xf32> -> vector<1x2xf32>
    %c0_71 = arith.constant 0 : index
    %75 = memref.load %arg8[%c0_71] : memref<1xf32, #tpu.memory_space<smem>>
    %76 = vector.broadcast %75 : f32 to vector<1x2xf32>
    %77 = arith.addf %74, %76 : vector<1x2xf32>
    %c0_72 = arith.constant 0 : index
    %c0_73 = arith.constant 0 : index
    %c0_74 = arith.constant 0 : index
    %78 = vector.load %arg9[%c0_72, %c0_73, %c0_74] : memref<1x1x2xf32, #tpu.memory_space<vmem>>, vector<1x1x2xf32>
    %79 = vector.shape_cast %78 : vector<1x1x2xf32> to vector<1x2xf32>
    %80 = vector.shape_cast %77 : vector<1x2xf32> to vector<1x1x2xf32>
    tpu.vector_store %arg9[%c0_72, %c0_73, %c0_74], %80 {strides = array<i32>} : memref<1x1x2xf32, #tpu.memory_space<vmem>>, vector<1x1x2xf32>,
    return
  }
  func.func @transform_0(%arg0: i32) -> (i32, i32, i32) {
    %c0_i32 = arith.constant 0 : i32
    %c0_i32_0 = arith.constant 0 : i32
    %c0_i32_1 = arith.constant 0 : i32
    return %arg0, %c0_i32, %c0_i32_0 : i32, i32, i32
  }
  func.func @transform_1(%arg0: i32) -> (i32, i32) {
    %c0_i32 = arith.constant 0 : i32
    %c0_i32_0 = arith.constant 0 : i32
    %c0_i32_1 = arith.constant 0 : i32
    return %c0_i32, %c0_i32_0 : i32, i32
  }
  func.func @transform_2(%arg0: i32) -> (i32, i32) {
    %c0_i32 = arith.constant 0 : i32
    %c0_i32_0 = arith.constant 0 : i32
    %c0_i32_1 = arith.constant 0 : i32
    return %c0_i32, %c0_i32_0 : i32, i32
  }
  func.func @transform_3(%arg0: i32) -> (i32, i32, i32) {
    %c0_i32 = arith.constant 0 : i32
    %c0_i32_0 = arith.constant 0 : i32
    %c0_i32_1 = arith.constant 0 : i32
    %c0_i32_2 = arith.constant 0 : i32
    return %c0_i32, %c0_i32_0, %c0_i32_1 : i32, i32, i32
  }
  func.func @transform_4(%arg0: i32) -> (i32, i32, i32) {
    %c0_i32 = arith.constant 0 : i32
    %c0_i32_0 = arith.constant 0 : i32
    %c0_i32_1 = arith.constant 0 : i32
    %c0_i32_2 = arith.constant 0 : i32
    return %c0_i32, %c0_i32_0, %c0_i32_1 : i32, i32, i32
  }
  func.func @transform_5(%arg0: i32) -> (i32, i32) {
    %c0_i32 = arith.constant 0 : i32
    %c0_i32_0 = arith.constant 0 : i32
    %c0_i32_1 = arith.constant 0 : i32
    return %c0_i32, %c0_i32_0 : i32, i32
  }
  func.func @transform_6(%arg0: i32) -> (i32, i32) {
    %c0_i32 = arith.constant 0 : i32
    %c0_i32_0 = arith.constant 0 : i32
    %c0_i32_1 = arith.constant 0 : i32
    return %c0_i32, %c0_i32_0 : i32, i32
  }
  func.func @transform_7(%arg0: i32) -> i32 {
    %c0_i32 = arith.constant 0 : i32
    %c0_i32_0 = arith.constant 0 : i32
    return %c0_i32 : i32
  }
  func.func @transform_8(%arg0: i32) -> (i32, i32, i32) {
    %c0_i32 = arith.constant 0 : i32
    %c0_i32_0 = arith.constant 0 : i32
    %c0_i32_1 = arith.constant 0 : i32
    return %arg0, %c0_i32, %c0_i32_0 : i32, i32, i32
  }
}

</mosaic_0001>

<bundles_post_ra>
// kernel: convnet_forward.1
= control target key start
LH: loop header
LB: loop body
LE: loop exit
PB: predicated region body
PF: predicated region fallthrough
CT: control target
= control target key end

     0   :  { %s666_s9 = smov 12   ;;  %s667_s10 = smov 6   ;;  %vm31_vm0 = vcmask 424960   ;;  %v670_v5 = vmov 0.0   ;;  %s866_s0 = inlined_call_operand.vmem [shape: f32[2,4,20], index: 0, kind: input, shape index: {}]   ;;  %s867_s1 = inlined_call_operand.vmem [shape: f32[20,72], index: 1, kind: input, shape index: {}]   ;;  %s868_s2 = inlined_call_operand.vmem [shape: f32[20,1], index: 2, kind: input, shape index: {}]   ;;  %s869_s3 = inlined_call_operand.vmem [shape: f32[1,20,20], index: 3, kind: input, shape index: {}]   ;;  %s870_s4 = inlined_call_operand.vmem [shape: f32[9,1,40], index: 4, kind: input, shape index: {}]   ;;  %s871_s5 = inlined_call_operand.vmem [shape: f32[20,40], index: 5, kind: input, shape index: {}]   ;;  %s872_s6 = inlined_call_operand.vmem [shape: f32[40,2], index: 6, kind: input, shape index: {}]   ;;  %s873_s7 = inlined_call_operand.<no memory space> [shape: f32[1], index: 7, kind: input, shape index: {}]   ;;  %s874_s8 = inlined_call_operand.hbm [shape: f32[1,1,2], index: 8, kind: output, shape index: {}]  }
   0x1   :  { %v533_v0 = vld [vmem:[%s870_s4 + $0x8] ss:$0 sm:$0xff]  ;;  %v33_v1 = vld [vmem:[%s866_s0] sm:$0xf]  ;;  %v531_v2 = vld [vmem:[%s870_s4 + $0x7] ss:$0 sm:$0xff]  ;;  %566 = vmatprep.subr.mxu0 %v670_v5  ;;  %593 = vmatprep.subr.mxu1 %v670_v5 }
   0x2   :  { %175 = vrot.lane.b32.xlu1 %v533_v0, %s666_s9  ;;  %35 = vrot.lane.b32.xlu0 %v33_v1, %s667_s10  ;;  %v518_v3 = vld [vmem:[%s866_s0 + $0x4] sm:$0xf]  ;;  %s668_s15 = smov 11   ;;  %s669_s16 = smov 26   ;;  %32 = vst.msk [vmem:[#allocation2] sm:$0xff] %vm31_vm0, %v670_v5 }
   0x3   :  { %v527_v4 = vld [vmem:[%s870_s4 + $0x5] ss:$0 sm:$0xff]  ;;  %v529_v6 = vld [vmem:[%s870_s4 + $0x6] ss:$0 sm:$0xff] }
   0x6   :  { %158 = vrot.lane.b32.xlu1 %v531_v2, %s668_s15  ;;  %43 = vrot.lane.b32.xlu0 %v518_v3, %s669_s16 }
   0x7   :  { %14 = vsyncpa [#allocation6], 0  ;;  %s671_s0 = smov 7   ;;  %s672_s21 = smov 10   ;;  %v523_v7 = vld [vmem:[%s870_s4 + $0x2] ss:$0 sm:$0xff] }
   0x8   :  { %v525_v8 = vld [vmem:[%s870_s4 + $0x3] ss:$0 sm:$0xff]  ;;  %s673_s26 = smov 2   ;;  %s674_s27 = smov 5   ;;  %v521_v9 = vld [vmem:[%s870_s4 + $0x1] ss:$0 sm:$0xff] }
   0x9   :  { %s675_s30 = smov 1   ;;  %vm38_vm1 = vcmask 207920   ;;  %vm46_vm2 = vcmask 371920   ;;  %v519_v13 = vld [vmem:[%s870_s4] ss:$0 sm:$0xff]  ;;  %vm57_vm3 = vcmask 326656  }
   0xa   :  { %124 = vrot.lane.b32.xlu1 %v527_v4, %s671_s0  ;;  %141 = vrot.lane.b32.xlu0 %v529_v6, %s672_s21  ;;  %s676_s11 = smov 116   ;;  %s677_s12 = smov 117   ;;  %v312_v27 = vld [vmem:[%s871_s5 + $0x10] sm:$0xf]  ;;  %vm323_vm4 = vcmask 1043456   ;;  %v311_v30 = vld [vmem:[%s871_s5 + $0x8] sm:$0xff] }
   0xb   :  { %s678_s13 = smov 118   ;;  %s679_s4 = smov 121   ;;  %594 = vmatpush3.msk.msra.mxu1 %vm323_vm4, %v312_v27  ;;  %vm682_vm5 = vmmov 0   ;;  %v310_v31 = vld [vmem:[%s871_s5] sm:$0xff]  ;;  %vm313_vm6 = vcmask 162816   ;;  %v308_v33 = vld [vmem:[%s869_s3 + $0x8] sm:$0xff] }
   0xc   :  { %s680_s14 = smov 122   ;;  %s681_s15 = smov 123   ;;  %595 = vmatprep.subr.mxu1 %v670_v5  ;;  %584 = vmatprep.mubr.msk.f32.mxu0 %vm682_vm5, %v670_v5  ;;  %v307_v32 = vld [vmem:[%s869_s3] sm:$0xff]  ;;  %v309_v34 = vld [vmem:[%s869_s3 + $0x10] sm:$0xf]  ;;  %v685_v36 = vmov 0  }
   0xd   :  { %596 = vmatpush3.msra.mxu1 %v311_v30  ;;  %s683_s20 = smov 126   ;;  %s684_s0 = smov 127   ;;  %599 = vmatprep.mubr.msk.f32.mxu1 %vm682_vm5, %v670_v5  ;;  %v196_v35 = vld [vmem:[%s868_s2] sm:$0xff]  ;;  %v197_v37 = vld [vmem:[%s868_s2 + $0x8] sm:$0xff]  ;;  %v198_v38 = vld [vmem:[%s868_s2 + $0x10] sm:$0xf] }
   0xe   :  { %84 = vrot.lane.b32.xlu1 %v523_v7, %s673_s26  ;;  %101 = vrot.lane.b32.xlu0 %v525_v8, %s674_s27  ;;  %v184_v55 = vld [vmem:[%s867_s1] sm:$0xff]  ;;  %vm214_vm7 = vcmask 588800   ;;  %v185_v57 = vld [vmem:[%s867_s1 + $0x8] sm:$0xff]  ;;  %vm413_vm8 = vcmask 322560   ;;  %s686_s24 = smov [#allocation5]   ;;  %vm502_vm9 = vcmask 8192  }
   0xf   :  { %597 = vmatprep.subr.mxu1 %v670_v5  ;;  %642 = vset.pattern.permute.xlu1 %v685_v36  ;;  %v186_v58 = vld [vmem:[%s867_s1 + $0x10] sm:$0xf]  ;;  %v426_v1 = vld [vmem:[%s872_s6 + $0x20] sm:$0xff]  ;;  %v425_v2 = vld [vmem:[%s872_s6 + $0x18] sm:$0xff]  ;;  %s510_s25 = sshll.u32 %s686_s24, 4  ;;  %s511_s25 = int_to_ptr.vmem [resolvable:$true] %s510_s25 }
  0x10   :  { %598 = vmatpush3.msra.mxu1 %v310_v31  ;;  %643 = vset.pattern.permute.xlu0 %v685_v36  ;;  %v424_v3 = vld [vmem:[%s872_s6 + $0x10] sm:$0xff]  ;;  %v423_v4 = vld [vmem:[%s872_s6 + $0x8] sm:$0xff]  ;;  %v422_v6 = vld [vmem:[%s872_s6] sm:$0xff]  ;;  %s644_s5 = scalar_lea.vmem %s511_s25, 16  ;;  %s648_s26 = scalar_lea.vmem %s511_s25, 32 }
  0x11   :  { %600 = vmatmul.mubr.msk.f32.vlgmr.msra.gmra.mxu1 %vm313_vm6, %v307_v32  ;;  %608 = vmatprep.subr.mxu1 %v670_v5  ;;  %p645_p0 = scmp.ne.s32.totalorder %s511_s25, %s644_s5  ;;  %p649_p1 = scmp.lt.s32.totalorder %s511_s25, %s511_s25 }
  0x12   :  { %67 = vrot.lane.b32.xlu0 %v521_v9, %s675_s30  ;;  %602 = vmatprep.mubr.msk.f32.mxu1 %vm682_vm5, %v670_v5  ;;  %p650_p2 = scmp.lt.s32.totalorder %s648_s26, %s644_s5 }
  0x13   :  { %609 = vmatpush3.msra.mxu1 %v426_v1 }
  0x14   :  { %610 = vmatprep.subr.mxu1 %v670_v5  ;;  %p651_p3 = por %p650_p2, %p649_p1 }
  0x15   :  { %603 = vmatmul.mubr.msk.f32.gmra.mxu1 %vm313_vm6, %v308_v33 }
  0x16   :  { %605 = vmatprep.mubr.msk.f32.mxu1 %vm682_vm5, %v670_v5  ;;  %611 = vmatpush3.msra.mxu1 %v425_v2  ;;  %p652_p4 = pnand %p651_p3, %p645_p0 }
  0x17   :  { %612 = vmatprep.subr.mxu1 %v670_v5 }
  0x18   :  { %613 = vmatpush3.msra.mxu1 %v424_v3 }
  0x19   :  { %606 = vmatmul.mubr.msk.f32.gmra.mxu1 %vm313_vm6, %v309_v34  ;;  %614 = vmatprep.subr.mxu1 %v670_v5 }
  0x1a   :  { %618 = vmatprep.mubr.msk.f32.mxu1 %vm682_vm5, %v670_v5  ;;  %615 = vmatpush3.msra.mxu1 %v423_v4 }
  0x1b   :  { %616 = vmatprep.subr.mxu1 %v670_v5 }
  0x1c   :  { %617 = vmatpush3.msra.mxu1 %v422_v6 }
  0x74   :  { %v36_v10 = vpop.permute.xlu0 %35  ;;  %v176_v12 = vpop.permute.xlu1 %175 }
  0x75   :  { %39 = vst.msk [vmem:[#allocation2] sm:$0xf] %vm38_vm1, %v36_v10 }
  0x78   :  { %v44_v11 = vpop.permute.xlu0 %43  ;;  %v159_v14 = vpop.permute.xlu1 %158 }
  0x79   :  { %47 = vst.msk [vmem:[#allocation2] sm:$0xf] %vm46_vm2, %v44_v11 }
  0x7c   :  { %v142_v15 = vpop.permute.xlu0 %141  ;;  %v125_v20 = vpop.permute.xlu1 %124 }
  0x80   :  { %v48_v16 = vld [vmem:[#allocation2] sm:$0xff]  ;;  %v102_v21 = vpop.permute.xlu0 %101  ;;  %v85_v25 = vpop.permute.xlu1 %84 }
  0x81   :  { %v56_v17 = vmul.f32 %v519_v13, %v48_v16  ;;  %v178_v18 = vmul.f32 %v176_v12, %v48_v16  ;;  %v161_v19 = vmul.f32 %v159_v14, %v48_v16  ;;  %v127_v22 = vmul.f32 %v125_v20, %v48_v16 }
  0x82   :  { %v144_v23 = vmul.f32 %v142_v15, %v48_v16  ;;  %v104_v24 = vmul.f32 %v102_v21, %v48_v16  ;;  %v87_v28 = vmul.f32 %v85_v25, %v48_v16 }
  0x83   :  { %58 = vst.msk [vmem:[#allocation3] sm:$0xff] %vm57_vm3, %v56_v17  ;;  %180 = vrot.lane.b32.xlu1 %v178_v18, %s676_s11  ;;  %163 = vrot.lane.b32.xlu0 %v161_v19, %s677_s12 }
  0x84   :  { %v68_v26 = vpop.permute.xlu0 %67 }
  0x85   :  { %v70_v29 = vmul.f32 %v68_v26, %v48_v16 }
  0x87   :  { %146 = vrot.lane.b32.xlu1 %v144_v23, %s678_s13  ;;  %129 = vrot.lane.b32.xlu0 %v127_v22, %s679_s4 }
  0x8a   :  { %v187_v56 = vld [vmem:[#allocation3] sm:$0xff] }
  0x8b   :  { %112 = vrot.lane.b32.xlu1 %v48_v16, %s680_s14  ;;  %106 = vrot.lane.b32.xlu0 %v104_v24, %s681_s15 }
  0x8f   :  { %89 = vrot.lane.b32.xlu1 %v87_v28, %s683_s20  ;;  %72 = vrot.lane.b32.xlu0 %v70_v29, %s684_s0 }
  0x93   :  { %201 = vperm.xlu1 %642, %v196_v35   ;;  %206 = vperm.xlu0 %643, %v197_v37   ;;  %v428_v35 = vstv %s873_s7 }
  0x97   :  { %211 = vperm.xlu1 %642, %v198_v38  }
  0xd1   :  { %v393_v59 = vpop.f32.mrf.mxu1 }
  0xd3   :  { %v601_v60 = vpop.f32.mrf.mxu1 }
  0xd5   :  { %v398_v61 = vpop.f32.mrf.mxu1 }
  0xd7   :  { %v604_v62 = vpop.f32.mrf.mxu1 }
  0xd9   :  { %v403_v63 = vpop.f32.mrf.mxu1 }
  0xdb   :  { %v607_v0 = vpop.f32.mrf.mxu1 }
  0xf5   :  { %v181_v39 = vpop.permute.xlu1 %180  ;;  %v164_v40 = vpop.permute.xlu0 %163 }
  0xf6   :  { %183 = vst.msk [vmem:[#allocation3 + $0x40] sm:$0xff] %vm57_vm3, %v181_v39  ;;  %166 = vst.msk [vmem:[#allocation3 + $0x38] sm:$0xff] %vm57_vm3, %v164_v40 }
  0xf9   :  { %v147_v41 = vpop.permute.xlu1 %146  ;;  %v130_v42 = vpop.permute.xlu0 %129 }
  0xfa   :  { %149 = vst.msk [vmem:[#allocation3 + $0x30] sm:$0xff] %vm57_vm3, %v147_v41  ;;  %132 = vst.msk [vmem:[#allocation3 + $0x28] sm:$0xff] %vm57_vm3, %v130_v42 }
  0xfd   :  { %v113_v43 = vpop.permute.xlu1 %112  ;;  %v107_v44 = vpop.permute.xlu0 %106  ;;  %v195_v45 = vld [vmem:[#allocation3 + $0x40] sm:$0xff]  ;;  %v194_v46 = vld [vmem:[#allocation3 + $0x38] sm:$0xff] }
  0xfe   :  { %115 = vst.msk [vmem:[#allocation3 + $0x20] sm:$0xff] %vm57_vm3, %v113_v43  ;;  %109 = vst.msk [vmem:[#allocation3 + $0x18] sm:$0xff] %vm57_vm3, %v107_v44  ;;  %567 = vmatpush3.msra.mxu0 %v195_v45 }
  0xff   :  { %568 = vmatprep.subr.mxu0 %v670_v5 }
 0x100   :  { %569 = vmatpush3.msra.mxu0 %v194_v46 }
 0x101   :  { %570 = vmatprep.subr.mxu0 %v670_v5  ;;  %v90_v47 = vpop.permute.xlu1 %89  ;;  %v73_v48 = vpop.permute.xlu0 %72  ;;  %v193_v49 = vld [vmem:[#allocation3 + $0x30] sm:$0xff]  ;;  %v192_v50 = vld [vmem:[#allocation3 + $0x28] sm:$0xff] }
 0x102   :  { %92 = vst.msk [vmem:[#allocation3 + $0x10] sm:$0xff] %vm57_vm3, %v90_v47  ;;  %75 = vst.msk [vmem:[#allocation3 + $0x8] sm:$0xff] %vm57_vm3, %v73_v48  ;;  %571 = vmatpush3.msra.mxu0 %v193_v49 }
 0x103   :  { %572 = vmatprep.subr.mxu0 %v670_v5 }
 0x104   :  { %573 = vmatpush3.msra.mxu0 %v192_v50 }
 0x105   :  { %574 = vmatprep.subr.mxu0 %v670_v5  ;;  %v191_v51 = vld [vmem:[#allocation3 + $0x20] sm:$0xff]  ;;  %v190_v52 = vld [vmem:[#allocation3 + $0x18] sm:$0xff] }
 0x106   :  { %575 = vmatpush3.msra.mxu0 %v191_v51 }
 0x107   :  { %576 = vmatprep.subr.mxu0 %v670_v5 }
 0x108   :  { %577 = vmatpush3.msra.mxu0 %v190_v52 }
 0x109   :  { %578 = vmatprep.subr.mxu0 %v670_v5  ;;  %v189_v53 = vld [vmem:[#allocation3 + $0x10] sm:$0xff]  ;;  %v188_v54 = vld [vmem:[#allocation3 + $0x8] sm:$0xff] }
 0x10a   :  { %579 = vmatpush3.msra.mxu0 %v189_v53 }
 0x10b   :  { %580 = vmatprep.subr.mxu0 %v670_v5 }
 0x10c   :  { %581 = vmatpush3.msra.mxu0 %v188_v54 }
 0x10d   :  { %582 = vmatprep.subr.mxu0 %v670_v5 }
 0x10e   :  { %583 = vmatpush3.msra.mxu0 %v187_v56  ;;  %v202_v7 = vpop.permute.xlu1 %201  ;;  %v207_v11 = vpop.permute.xlu0 %206 }
 0x10f   :  { %585 = vmatmul.mubr.msk.f32.vlgmr.msra.gmra.mxu0 %vm214_vm7, %v184_v55 }
 0x110   :  { %587 = vmatprep.mubr.msk.f32.mxu0 %vm682_vm5, %v670_v5 }
 0x112   :  { %v212_v17 = vpop.permute.xlu1 %211 }
 0x113   :  { %588 = vmatmul.mubr.msk.f32.gmra.mxu0 %vm214_vm7, %v185_v57 }
 0x114   :  { %590 = vmatprep.mubr.msk.f32.mxu0 %vm682_vm5, %v670_v5 }
 0x117   :  { %591 = vmatmul.mubr.msk.f32.gmra.mxu0 %vm214_vm7, %v186_v58 }
 0x1cf   :  { %v290_v8 = vpop.f32.mrf.mxu0 }
 0x1d0   :  { %v291_v9 = vadd.f32 %v290_v8, %v202_v7 }
 0x1d1   :  { %v586_v10 = vpop.f32.mrf.mxu0 }
 0x1d2   :  { %v304_v13 = vmax.f32 %v291_v9, 0.0 }
 0x1d3   :  { %v295_v12 = vpop.f32.mrf.mxu0 }
 0x1d4   :  { %v296_v14 = vadd.f32 %v295_v12, %v207_v11  ;;  %v407_v19 = vmul.f32 %v393_v59, %v304_v13 }
 0x1d5   :  { %v589_v15 = vpop.f32.mrf.mxu0 }
 0x1d6   :  { %v305_v16 = vmax.f32 %v296_v14, 0.0  ;;  %v410_v24 = vsel %vm57_vm3, %v407_v19, 0.0 }
 0x1d7   :  { %v300_v18 = vpop.f32.mrf.mxu0 }
 0x1d8   :  { %v408_v20 = vmul.f32 %v398_v61, %v305_v16  ;;  %v301_v5 = vadd.f32 %v300_v18, %v212_v17 }
 0x1d9   :  { %v592_v21 = vpop.f32.mrf.mxu0 }
 0x1da   :  { %v411_v22 = vsel %vm57_vm3, %v408_v20, 0.0  ;;  %v306_v23 = vmax.f32 %v301_v5, 0.0 }
 0x1db   :  { %v412_v26 = vadd.f32 %v411_v22, %v410_v24 }
 0x1dc   :  { %v409_v25 = vmul.f32 %v403_v63, %v306_v23 }
 0x1de   :  { %v414_v27 = vsel %vm413_vm8, %v409_v25, 0.0 }
 0x1df   :  { %v415_v28 = vadd.f32 %v414_v27, %v412_v26 }
 0x1e1   :  { %v416_v29 = vrot.slane %v415_v28, 4 }
 0x1e3   :  { %v417_v30 = vadd.f32 %v416_v29, %v415_v28 }
 0x1e5   :  { %v418_v31 = vrot.slane %v417_v30, 2 }
 0x1e7   :  { %v419_v32 = vadd.f32 %v418_v31, %v417_v30 }
 0x1e9   :  { %v420_v33 = vrot.slane %v419_v32, 1 }
 0x1eb   :  { %v421_v34 = vadd.f32 %v420_v33, %v419_v32 }
 0x1ed   :  { %619 = vmatmul.mubr.msk.f32.vlgmr.msra.gmra.mxu1 %vm57_vm3, %v421_v34 }
 0x2ad   :  { %v498_v36 = vpop.f32.mrf.mxu1 }
 0x2ae   :  { %v499_v37 = vadd.f32 %v498_v36, %v428_v35 }
 0x2af   :  { %v620_v38 = vpop.f32.mrf.mxu1 }
 0x2b0   :  { %503 = vst.msk [vmem:[#allocation5] sm:$0x1] %vm502_vm9, %v499_v37 }
 0x2b1   :  { %655 = shalt.err (!%p652_p4)
}
 0x2b2   :  { %513 = dma.vmem_to_hbm [thread:$0]  %s511_s25, 16, %s874_s8, [#allocation6]  }
 0x2b3   :  { %664 = dma.done.wait [#allocation6], 16  }
 0x2b4   :  { %665 = vsyncadd [#allocation6], 4294967280 }
 0x2b5   :  { %517 = vsyncpa [#allocation6], 1 }

</bundles_post_ra>
